<compile_context>
chip_gen: v7x
topology: tpu7x:2x2x1
jax: 0.10.0
libtpu: 0.0.40
codegen_flags: <defaults>
</compile_context>

<pallas_src>
import jax
import jax.numpy as jnp
from jax.experimental import pallas as pl
from jax.experimental.pallas import tpu as pltpu

LANE = 128     # lane width (last dim of every tile)
SUB = 16       # sublane quantum covering f32 (8) and bf16 (16) packing
CHUNK = 512    # rows per inner streaming chunk (multiple of SUB)


def _round_up(n, m):
    return ((n + m - 1) // m) * m


def _make_wl1_kernel(rows_valid, tile_rows, chunk_rows, need_mask):
    """Build the per-block kernel with static tiling parameters baked in.

    Each grid step streams its (tile_rows, 128) x/w block in chunk_rows-row
    chunks (single pass over the data) and writes one (8, 128) slab of
    per-lane partial sums:
      row 0: sum |x|      over w == 0
      row 1: sum |x - w|  over w > 0
      row 2: sum |x - w|  over w < 0
      row 3: count        of  w > 0
      row 4: count        of  w < 0
      rows 5-7: zeros (sublane alignment)
    The w == 0 count is not accumulated; the wrapper derives it from the
    static element count.
    """
    num_chunks = tile_rows // chunk_rows

    def kernel(x_ref, w_ref, o_ref):
        block_row0 = pl.program_id(0) * tile_rows

        def body(c, carry):
            s_z, s_p, s_n, c_p, c_n = carry
            r0 = pl.multiple_of(c * chunk_rows, chunk_rows)
            x = x_ref[pl.ds(r0, chunk_rows), :].astype(jnp.float32)
            w = w_ref[pl.ds(r0, chunk_rows), :].astype(jnp.float32)

            if need_mask:
                # Rows past `rows_valid` belong to the ragged final block and
                # hold unspecified data: zero both operands.  (x=0, w=0)
                # contributes nothing to any bucket, and the w==0 count is
                # derived from the true total in the wrapper.
                row = (block_row0 + r0
                       + jax.lax.broadcasted_iota(jnp.int32,
                                                  (chunk_rows, LANE), 0))
                ok = row < rows_valid
                x = jnp.where(ok, x, 0.0)
                w = jnp.where(ok, w, 0.0)

            pos = w > 0
            neg = w < 0
            d = jnp.abs(x - w)            # == |x| wherever w == 0
            s_z = s_z + jnp.sum(jnp.where(pos | neg, 0.0, d),
                                axis=0, keepdims=True)
            s_p = s_p + jnp.sum(jnp.where(pos, d, 0.0), axis=0, keepdims=True)
            s_n = s_n + jnp.sum(jnp.where(neg, d, 0.0), axis=0, keepdims=True)
            c_p = c_p + jnp.sum(pos.astype(jnp.float32), axis=0, keepdims=True)
            c_n = c_n + jnp.sum(neg.astype(jnp.float32), axis=0, keepdims=True)
            return s_z, s_p, s_n, c_p, c_n

        zero_row = jnp.zeros((1, LANE), jnp.float32)
        init = (zero_row, zero_row, zero_row, zero_row, zero_row)
        s_z, s_p, s_n, c_p, c_n = jax.lax.fori_loop(0, num_chunks, body, init)

        # Single aligned (8, 128) store instead of several masked sublane
        # stores.
        o_ref[0, :, :] = jnp.concatenate(
            [s_z, s_p, s_n, c_p, c_n, jnp.zeros((3, LANE), jnp.float32)],
            axis=0)

    return kernel


def wl1_loss(inputs, weight, *, tile_rows=4096):
    """Pallas implementation of wL1Loss.forward(inputs, weight) -> scalar."""
    assert inputs.shape == weight.shape
    total = int(inputs.size)

    x = inputs.reshape(-1)
    w = weight.reshape(-1)

    # Lane-dense (rows, 128) view.  Only pad to the next multiple of 128
    # (<=127 zero elements) when needed; padded (x=0, w=0) elements contribute
    # nothing to any bucket, so no count correction is required.  When
    # total % 128 == 0 the reshape is a pure bitcast (no copy).
    rows = -(-total // LANE)
    rem = total % LANE
    if rem:
        x = jnp.pad(x, (0, LANE - rem))
        w = jnp.pad(w, (0, LANE - rem))
    x = x.reshape(rows, LANE)
    w = w.reshape(rows, LANE)

    # Row tiling: big tiles amortize per-grid-step overhead; the inner chunk
    # loop keeps temporaries bounded.  Small inputs collapse to one (possibly
    # partial) block; the ragged tail is masked inside the kernel.
    tile_req = max(CHUNK, _round_up(tile_rows, CHUNK))
    if rows >= tile_req:
        tm, chunk = tile_req, CHUNK
    else:
        chunk = min(CHUNK, _round_up(rows, SUB))
        tm = _round_up(rows, chunk)
    nb = -(-rows // tm)
    need_mask = (nb * tm) != rows

    kernel = _make_wl1_kernel(rows, tm, chunk, need_mask)
    in_spec = pl.BlockSpec((tm, LANE), lambda i: (i, 0))

    parts = pl.pallas_call(
        kernel,
        out_shape=jax.ShapeDtypeStruct((nb, 8, LANE), jnp.float32),
        grid_spec=pltpu.PrefetchScalarGridSpec(
            num_scalar_prefetch=0,
            grid=(nb,),
            in_specs=[in_spec, in_spec],
            out_specs=pl.BlockSpec((1, 8, LANE), lambda i: (i, 0, 0)),
        ),
        compiler_params=pltpu.CompilerParams(
            dimension_semantics=("parallel",),
            vmem_limit_bytes=48 * 1024 * 1024,
        ),
    )(x, w)

    sums = jnp.sum(parts[:, :5, :], axis=(0, 2))       # (5,) bucket totals
    s_zero, s_pos, s_neg, n_pos, n_neg = (sums[0], sums[1], sums[2],
                                          sums[3], sums[4])
    n_zero = total - n_pos - n_neg                      # derived w==0 count
    return (s_zero / (n_zero + 0.001)
            + s_pos / (n_pos + 0.001)
            + s_neg / (n_neg + 0.001))


def wl1_loss_ref(inputs, weight):
    """Plain-JAX reference mirroring the PyTorch module."""
    x = inputs.astype(jnp.float32)
    w = weight.astype(jnp.float32)
    m0 = (w == 0).astype(jnp.float32)
    mp = (w > 0).astype(jnp.float32)
    mn = (w < 0).astype(jnp.float32)
    n0 = jnp.sum(m0)
    npos = jnp.sum(mp)
    nneg = jnp.sum(mn)
    return (jnp.sum(jnp.abs(x * m0)) / (n0 + 0.001)
            + jnp.sum(jnp.abs(x * mp - w * mp)) / (npos + 0.001)
            + jnp.sum(jnp.abs(x * mn - w * mn)) / (nneg + 0.001))


if __name__ == "__main__":
    key = jax.random.PRNGKey(0)
    k1, k2, k3, k4 = jax.random.split(key, 4)

    # Small NCHW inputs: batch=2, channels=4, spatial=16x16 (size % 128 == 0:
    # no padding, single aligned block, no in-kernel mask).
    inputs = jax.random.normal(k1, (2, 4, 16, 16), dtype=jnp.float32)
    w_raw = jax.random.normal(k2, (2, 4, 16, 16), dtype=jnp.float32)
    weight = jnp.where(jnp.abs(w_raw) < 0.5, 0.0, w_raw)

    loss = jax.block_until_ready(wl1_loss(inputs, weight))
    loss_ref = jax.block_until_ready(wl1_loss_ref(inputs, weight))
    assert jnp.allclose(loss, loss_ref, rtol=1e-5, atol=1e-5), (loss, loss_ref)

    # Awkward shape: size not a multiple of 128 -> exercises the 128-pad, the
    # in-kernel ragged-block mask and the multi-chunk inner loop.
    inputs2 = jax.random.normal(k3, (2, 8, 130, 97), dtype=jnp.float32)
    w2_raw = jax.random.normal(k4, (2, 8, 130, 97), dtype=jnp.float32)
    weight2 = jnp.where(jnp.abs(w2_raw) < 0.5, 0.0, w2_raw)

    loss2 = jax.block_until_ready(wl1_loss(inputs2, weight2))
    loss2_ref = jax.block_until_ready(wl1_loss_ref(inputs2, weight2))
    assert jnp.allclose(loss2, loss2_ref, rtol=1e-5, atol=1e-5), (loss2, loss2_ref)

    # Same data with a small tile -> exercises a multi-block "parallel" grid
    # with a ragged final block.
    loss3 = jax.block_until_ready(wl1_loss(inputs2, weight2, tile_rows=512))
    assert jnp.allclose(loss3, loss2_ref, rtol=1e-5, atol=1e-5), (loss3, loss2_ref)

    print("KERNEL_OK")
</pallas_src>

<mosaic_0001>
module attributes {stable_mosaic.version = 11 : i64} {
  func.func @kernel(%arg0: i32, %arg1: memref<16x128xf32, #tpu.memory_space<vmem>>, %arg2: memref<16x128xf32, #tpu.memory_space<vmem>>, %arg3: memref<1x8x128xf32, #tpu.memory_space<vmem>>) attributes {dimension_semantics = [#tpu.dimension_semantics<parallel>], iteration_bounds = array<i64: 1>, scalar_prefetch = 0 : i64, scratch_operands = 0 : i64, tpu.core_type = #tpu.core_type<tc>, window_params = [{transform_indices = @transform_0, window_bounds = array<i64: 16, 128>}, {transform_indices = @transform_1, window_bounds = array<i64: 16, 128>}, {transform_indices = @transform_2, window_bounds = array<i64: 1, 8, 128>}]} {
    %cst = arith.constant 0.000000e+00 : f32
    %0 = vector.broadcast %cst : f32 to vector<1x128xf32>
    %c0_i32 = arith.constant 0 : i32
    %c16_i32 = arith.constant 16 : i32
    %1 = arith.muli %c0_i32, %c16_i32 : i32
    %2 = tpu.assume_multiple %1, 16 : i32
    %3 = arith.index_cast %2 : i32 to index
    %c0 = arith.constant 0 : index
    %4 = vector.load %arg1[%3, %c0] : memref<16x128xf32, #tpu.memory_space<vmem>>, vector<16x128xf32>
    %5 = arith.index_cast %2 : i32 to index
    %c0_0 = arith.constant 0 : index
    %6 = vector.load %arg2[%5, %c0_0] : memref<16x128xf32, #tpu.memory_space<vmem>>, vector<16x128xf32>
    %cst_1 = arith.constant 0.000000e+00 : f32
    %7 = vector.broadcast %cst_1 : f32 to vector<16x128xf32>
    %8 = arith.cmpf ogt, %6, %7 : vector<16x128xf32>
    %cst_2 = arith.constant 0.000000e+00 : f32
    %9 = vector.broadcast %cst_2 : f32 to vector<16x128xf32>
    %10 = arith.cmpf olt, %6, %9 : vector<16x128xf32>
    %11 = arith.subf %4, %6 : vector<16x128xf32>
    %12 = math.absf %11 : vector<16x128xf32>
    %13 = arith.ori %8, %10 : vector<16x128xi1>
    %cst_3 = arith.constant 0.000000e+00 : f32
    %14 = vector.broadcast %cst_3 : f32 to vector<16x128xf32>
    %15 = arith.select %13, %14, %12 : vector<16x128xi1>, vector<16x128xf32>
    %cst_4 = arith.constant dense<0.000000e+00> : vector<128xf32>
    %16 = vector.multi_reduction <add>, %15, %cst_4 [0] : vector<16x128xf32> to vector<128xf32>
    %17 = vector.shape_cast %16 : vector<128xf32> to vector<1x128xf32>
    %18 = arith.addf %0, %17 : vector<1x128xf32>
    %cst_5 = arith.constant 0.000000e+00 : f32
    %19 = vector.broadcast %cst_5 : f32 to vector<16x128xf32>
    %20 = arith.select %8, %12, %19 : vector<16x128xi1>, vector<16x128xf32>
    %cst_6 = arith.constant dense<0.000000e+00> : vector<128xf32>
    %21 = vector.multi_reduction <add>, %20, %cst_6 [0] : vector<16x128xf32> to vector<128xf32>
    %22 = vector.shape_cast %21 : vector<128xf32> to vector<1x128xf32>
    %23 = arith.addf %0, %22 : vector<1x128xf32>
    %cst_7 = arith.constant 0.000000e+00 : f32
    %24 = vector.broadcast %cst_7 : f32 to vector<16x128xf32>
    %25 = arith.select %10, %12, %24 : vector<16x128xi1>, vector<16x128xf32>
    %cst_8 = arith.constant dense<0.000000e+00> : vector<128xf32>
    %26 = vector.multi_reduction <add>, %25, %cst_8 [0] : vector<16x128xf32> to vector<128xf32>
    %27 = vector.shape_cast %26 : vector<128xf32> to vector<1x128xf32>
    %28 = arith.addf %0, %27 : vector<1x128xf32>
    %29 = arith.extui %8 : vector<16x128xi1> to vector<16x128xi32>
    %30 = arith.sitofp %29 : vector<16x128xi32> to vector<16x128xf32>
    %cst_9 = arith.constant dense<0.000000e+00> : vector<128xf32>
    %31 = vector.multi_reduction <add>, %30, %cst_9 [0] : vector<16x128xf32> to vector<128xf32>
    %32 = vector.shape_cast %31 : vector<128xf32> to vector<1x128xf32>
    %33 = arith.addf %0, %32 : vector<1x128xf32>
    %34 = arith.extui %10 : vector<16x128xi1> to vector<16x128xi32>
    %35 = arith.sitofp %34 : vector<16x128xi32> to vector<16x128xf32>
    %cst_10 = arith.constant dense<0.000000e+00> : vector<128xf32>
    %36 = vector.multi_reduction <add>, %35, %cst_10 [0] : vector<16x128xf32> to vector<128xf32>
    %37 = vector.shape_cast %36 : vector<128xf32> to vector<1x128xf32>
    %38 = arith.addf %0, %37 : vector<1x128xf32>
    %c1_i32 = arith.constant 1 : i32
    %cst_11 = arith.constant 0.000000e+00 : f32
    %39 = vector.broadcast %cst_11 : f32 to vector<3x128xf32>
    %40 = tpu.concatenate %18, %23, %28, %33, %38, %39 in 0 : vector<1x128xf32>, vector<1x128xf32>, vector<1x128xf32>, vector<1x128xf32>, vector<1x128xf32>, vector<3x128xf32> -> vector<8x128xf32>
    %c0_12 = arith.constant 0 : index
    %c0_13 = arith.constant 0 : index
    %c0_14 = arith.constant 0 : index
    %41 = vector.load %arg3[%c0_12, %c0_13, %c0_14] : memref<1x8x128xf32, #tpu.memory_space<vmem>>, vector<1x8x128xf32>
    %42 = vector.shape_cast %41 : vector<1x8x128xf32> to vector<8x128xf32>
    %43 = vector.shape_cast %40 : vector<8x128xf32> to vector<1x8x128xf32>
    tpu.vector_store %arg3[%c0_12, %c0_13, %c0_14], %43 {strides = array<i32>} : memref<1x8x128xf32, #tpu.memory_space<vmem>>, vector<1x8x128xf32>,
    return
  }
  func.func @transform_0(%arg0: i32) -> (i32, i32) {
    %c0_i32 = arith.constant 0 : i32
    %c0_i32_0 = arith.constant 0 : i32
    return %arg0, %c0_i32 : i32, i32
  }
  func.func @transform_1(%arg0: i32) -> (i32, i32) {
    %c0_i32 = arith.constant 0 : i32
    %c0_i32_0 = arith.constant 0 : i32
    return %arg0, %c0_i32 : i32, i32
  }
  func.func @transform_2(%arg0: i32) -> (i32, i32, i32) {
    %c0_i32 = arith.constant 0 : i32
    %c0_i32_0 = arith.constant 0 : i32
    %c0_i32_1 = arith.constant 0 : i32
    return %arg0, %c0_i32, %c0_i32_0 : i32, i32, i32
  }
}

</mosaic_0001>

<bundles_post_ra>
// kernel: tpu_custom_call.1
= control target key start
LH: loop header
LB: loop body
LE: loop exit
PB: predicated region body
PF: predicated region fallthrough
CT: control target
= control target key end

     0   :  { %7 = vsyncpa [#allocation3], 0  ;;  %s292_s0 = inlined_call_operand.hbm [shape: f32[16,128], index: 0, kind: input, shape index: {}]   ;;  %s293_s1 = inlined_call_operand.hbm [shape: f32[16,128], index: 1, kind: input, shape index: {}]   ;;  %s294_s2 = inlined_call_operand.hbm [shape: f32[1,8,128], index: 2, kind: output, shape index: {}]  }
   0x1   :  { %8 = vsyncpa [#allocation6], 0 }
   0x2   :  { %9 = vsyncpa [#allocation4], 0  ;;  %s217_s9 = smov [#allocation2]   ;;  %s145_s13 = scalar_lea.hbm %s292_s0, 256 }
   0x3   :  { %s15_s10 = sshll.u32 %s217_s9, 4  ;;  %p146_p0 = scmp.ne.s32.totalorder %s292_s0, %s145_s13  ;;  %s16_s10 = int_to_ptr.vmem [resolvable:$true] %s15_s10 }
   0x4   :  { %p149_p1 = scmp.lt.u32.totalorder %s145_s13, %s292_s0 }
   0x6   :  { %p151_p2 = pnand %p149_p1, %p146_p0 }
   0x8   :  { %154 = shalt.err (!%p151_p2)
}
   0x9   :  { %s155_s18 = scalar_lea.vmem %s16_s10, 256  ;;  %p160_p4 = scmp.lt.s32.totalorder %s16_s10, %s16_s10 }
   0xa   :  { %p156_p3 = scmp.ne.s32.totalorder %s16_s10, %s155_s18  ;;  %p161_p5 = scmp.lt.s32.totalorder %s155_s18, %s155_s18 }
   0xc   :  { %p162_p6 = por %p161_p5, %p160_p4 }
   0xe   :  { %p163_p7 = pnand %p162_p6, %p156_p3 }
  0x10   :  { %166 = shalt.err (!%p163_p7)
}
  0x11   :  { %s218_s19 = smov 128   ;;  %s219_s20 = smov 8  }
  0x12   :  { %21 = dma.hbm_to_vmem [thread:$0]  %s292_s0, 256, %s16_s10, [#allocation3], %s218_s19, %s218_s19, %s219_s20  }
  0x13   :  { %s220_s23 = smov [#allocation5]   ;;  %s167_s27 = scalar_lea.hbm %s293_s1, 256 }
  0x14   :  { %s27_s24 = sshll.u32 %s220_s23, 4  ;;  %p168_p8 = scmp.ne.s32.totalorder %s293_s1, %s167_s27  ;;  %s28_s24 = int_to_ptr.vmem [resolvable:$true] %s27_s24 }
  0x15   :  { %p171_p9 = scmp.lt.u32.totalorder %s167_s27, %s293_s1 }
  0x17   :  { %p173_p10 = pnand %p171_p9, %p168_p8 }
  0x19   :  { %176 = shalt.err (!%p173_p10)
}
  0x1a   :  { %s177_s4 = scalar_lea.vmem %s28_s24, 256  ;;  %p182_p12 = scmp.lt.s32.totalorder %s28_s24, %s28_s24 }
  0x1b   :  { %p178_p11 = scmp.ne.s32.totalorder %s28_s24, %s177_s4  ;;  %p183_p13 = scmp.lt.s32.totalorder %s177_s4, %s177_s4 }
  0x1d   :  { %p184_p0 = por %p183_p13, %p182_p12 }
  0x1f   :  { %p185_p1 = pnand %p184_p0, %p178_p11 }
  0x21   :  { %188 = shalt.err (!%p185_p1)
}
  0x22   :  { %33 = dma.hbm_to_vmem [thread:$0]  %s293_s1, 256, %s28_s24, [#allocation6], %s218_s19, %s218_s19, %s219_s20  }
  0x23   :  { %211 = dma.done.wait [#allocation3], 256  }
  0x24   :  { %212 = vsyncadd [#allocation3], 4294967040 }
  0x25   :  { %213 = dma.done.wait [#allocation6], 256  }
  0x26   :  { %214 = vsyncadd [#allocation6], 4294967040  ;;  %v40_v0 = vld [vmem:[#allocation2] sm:$0xff]  ;;  %v41_v1 = vld [vmem:[#allocation2 + $0x8] sm:$0xff]  ;;  %v221_v7 = vmov 0.0   ;;  %vm108_vm6 = vcmask 1040384  }
  0x27   :  { %v42_v2 = vld [vmem:[#allocation5] sm:$0xff]  ;;  %v43_v3 = vld [vmem:[#allocation5 + $0x8] sm:$0xff]  ;;  %vm110_vm7 = vcmask 1041408   ;;  %vm112_vm8 = vcmask 1042432   ;;  %vm114_vm9 = vcmask 1043456   ;;  %s222_s1 = smov [#allocation7]  }
  0x28   :  { %vm44_vm0 = vcmp.gt.f32.partialorder %v42_v2, 0.0  ;;  %vm46_vm1 = vcmp.lt.f32.partialorder %v42_v2, 0.0  ;;  %v48_v4 = vsub.f32 %v40_v0, %v42_v2  ;;  %vm45_vm2 = vcmp.gt.f32.partialorder %v43_v3, 0.0  ;;  %s125_s6 = sshll.u32 %s222_s1, 4  ;;  %s126_s6 = int_to_ptr.vmem [resolvable:$true] %s125_s6 }
  0x29   :  { %vm47_vm3 = vcmp.lt.f32.partialorder %v43_v3, 0.0  ;;  %v49_v5 = vsub.f32 %v41_v1, %v43_v3  ;;  %vm264_vm4 = vmor %vm44_vm0, %vm46_vm1  ;;  %v135_v8 = vsel %vm44_vm0, 1.0, %v221_v7  ;;  %v136_v10 = vsel %vm45_vm2, 1.0, %v221_v7  ;;  %s189_s7 = scalar_lea.vmem %s126_s6, 128  ;;  %p194_p3 = scmp.lt.s32.totalorder %s126_s6, %s126_s6 }
  0x2a   :  { %v50_v9 = vand.u32 2147483647, %v48_v4  ;;  %vm53_vm5 = vmor %vm45_vm2, %vm47_vm3  ;;  %v137_v11 = vsel %vm46_vm1, 1.0, %v221_v7  ;;  %v138_v12 = vsel %vm47_vm3, 1.0, %v221_v7  ;;  %v88_v14 = vadd.f32 %v136_v10, %v135_v8  ;;  %p190_p2 = scmp.ne.s32.totalorder %s126_s6, %s189_s7  ;;  %p195_p4 = scmp.lt.s32.totalorder %s189_s7, %s189_s7 }
  0x2b   :  { %v51_v13 = vand.u32 2147483647, %v49_v5  ;;  %v100_v15 = vadd.f32 %v138_v12, %v137_v11  ;;  %vm116_vm10 = vcmask 1044480  }
  0x2c   :  { %v54_v16 = vsel %vm264_vm4, 0.0, %v50_v9  ;;  %v64_v17 = vsel %vm44_vm0, %v50_v9, 0.0  ;;  %v74_v18 = vsel %vm46_vm1, %v50_v9, 0.0  ;;  %v89_v22 = vrot.slane %v88_v14, 4  ;;  %p196_p5 = por %p195_p4, %p194_p3 }
  0x2d   :  { %v55_v19 = vsel %vm53_vm5, 0.0, %v51_v13  ;;  %v65_v20 = vsel %vm45_vm2, %v51_v13, 0.0  ;;  %v75_v21 = vsel %vm47_vm3, %v51_v13, 0.0  ;;  %v101_v26 = vrot.slane %v100_v15, 4 }
  0x2e   :  { %v56_v23 = vadd.f32 %v55_v19, %v54_v16  ;;  %v66_v24 = vadd.f32 %v65_v20, %v64_v17  ;;  %v76_v25 = vadd.f32 %v75_v21, %v74_v18  ;;  %v90_v27 = vadd.f32 %v89_v22, %v88_v14  ;;  %p197_p6 = pnand %p196_p5, %p190_p2 }
  0x2f   :  { %v102_v31 = vadd.f32 %v101_v26, %v100_v15 }
  0x30   :  { %v57_v28 = vrot.slane %v56_v23, 4  ;;  %v67_v29 = vrot.slane %v66_v24, 4  ;;  %v77_v30 = vrot.slane %v76_v25, 4  ;;  %v91_v32 = vrot.slane %v90_v27, 2 }
  0x31   :  { %v103_v36 = vrot.slane %v102_v31, 2 }
  0x32   :  { %v58_v33 = vadd.f32 %v57_v28, %v56_v23  ;;  %v68_v34 = vadd.f32 %v67_v29, %v66_v24  ;;  %v78_v35 = vadd.f32 %v77_v30, %v76_v25  ;;  %v92_v37 = vadd.f32 %v91_v32, %v90_v27 }
  0x33   :  { %v104_v41 = vadd.f32 %v103_v36, %v102_v31 }
  0x34   :  { %v59_v38 = vrot.slane %v58_v33, 2  ;;  %v69_v39 = vrot.slane %v68_v34, 2  ;;  %v79_v40 = vrot.slane %v78_v35, 2  ;;  %v93_v45 = vrot.slane %v92_v37, 1 }
  0x35   :  { %v105_v46 = vrot.slane %v104_v41, 1 }
  0x36   :  { %v60_v42 = vadd.f32 %v59_v38, %v58_v33  ;;  %v70_v43 = vadd.f32 %v69_v39, %v68_v34  ;;  %v80_v44 = vadd.f32 %v79_v40, %v78_v35  ;;  %v94_v53 = vadd.f32 %v93_v45, %v92_v37 }
  0x37   :  { %v106_v54 = vadd.f32 %v105_v46, %v104_v41 }
  0x38   :  { %v61_v47 = vrot.slane %v60_v42, 1  ;;  %v71_v48 = vrot.slane %v70_v43, 1  ;;  %v81_v49 = vrot.slane %v80_v44, 1 }
  0x3a   :  { %v62_v50 = vadd.f32 %v61_v47, %v60_v42  ;;  %v72_v51 = vadd.f32 %v71_v48, %v70_v43  ;;  %v82_v52 = vadd.f32 %v81_v49, %v80_v44 }
  0x3c   :  { %v109_v55 = vsel %vm108_vm6, %v62_v50, %v72_v51 }
  0x3d   :  { %v111_v56 = vsel %vm110_vm7, %v109_v55, %v82_v52 }
  0x3e   :  { %v113_v57 = vsel %vm112_vm8, %v111_v56, %v94_v53 }
  0x3f   :  { %v115_v58 = vsel %vm114_vm9, %v113_v57, %v106_v54 }
  0x40   :  { %v117_v59 = vsel %vm116_vm10, %v115_v58, 0.0 }
  0x41   :  { %118 = vst [vmem:[#allocation7] sm:$0xff] %v117_v59 }
  0x42   :  { %200 = shalt.err (!%p197_p6)
}
  0x43   :  { %s201_s10 = scalar_lea.hbm %s294_s2, 128 }
  0x44   :  { %p202_p7 = scmp.ne.s32.totalorder %s294_s2, %s201_s10  ;;  %p205_p8 = scmp.lt.u32.totalorder %s201_s10, %s294_s2 }
  0x46   :  { %p207_p9 = pnand %p205_p8, %p202_p7 }
  0x48   :  { %210 = shalt.err (!%p207_p9)
}
  0x49   :  { %128 = dma.vmem_to_hbm [thread:$0]  %s126_s6, 128, %s294_s2, [#allocation4]  }
  0x4a   :  { %215 = dma.done.wait [#allocation4], 128  }
  0x4b   :  { %216 = vsyncadd [#allocation4], 4294967168 }
  0x4c   :  { %132 = vsyncpa [#allocation3], 1 }
  0x4d   :  { %133 = vsyncpa [#allocation6], 1 }
  0x4e   :  { %134 = vsyncpa [#allocation4], 1 }

</bundles_post_ra>
